<compile_context>
chip_gen: v7x
topology: tpu7x:2x2x1
jax: 0.10.0
libtpu: 0.0.40
codegen_flags: <defaults>
</compile_context>

<pallas_src>
import jax
import jax.numpy as jnp
from jax.experimental import pallas as pl
from jax.experimental.pallas import tpu as pltpu


_LANE = 512                       # lane width for the tiny-D dense layout
_SMALL_FALLBACK_ELEMS = 1 << 17   # below ~512 KiB of f32 output, skip Pallas
_DENSE_D_MAX = 32                 # D below this uses the (D, rows, LANE) layout
_VMEM_LIMIT = 48 * 1024 * 1024    # explicit scoped-VMEM limit (safe everywhere)
_MIN_SPLIT_BYTES = 1 << 20        # split a 1-step grid only if output >= 1 MiB


def _round_up(a, b):
    return (a + b - 1) // b * b


def _block_budget_bytes():
    """Target bytes for one output block, per TPU generation."""
    try:
        kind = jax.devices()[0].device_kind.lower()
    except Exception:
        kind = ""
    if "v5 lite" in kind or "v5e" in kind or "v5lite" in kind:
        return 4 * 1024 * 1024    # ~820 GB/s HBM: 4 MiB blocks already amortize
    return 8 * 1024 * 1024        # v6e / v7x (and default): bigger blocks


# ---------------------------------------------------------------------------
# Kernel 1: natural (N, D) layout, D >= 32.  Ragged edges handled by Pallas
# block masking (no pre-pad, no post-slice).
#   x   : (N, 1)     block (TILE_N, 1)        index (i, 0)
#   w,b : (1, D)     block (1, TILE_D)        index (0, j)   (resident across i)
#   out : (N, D)     block (TILE_N, TILE_D)   index (i, j)
# ---------------------------------------------------------------------------
def _natural_kernel(x_ref, w_ref, b_ref, o_ref):
    # (TILE_N, 1) * (1, TILE_D) + (1, TILE_D) -> (TILE_N, TILE_D); pure VPU.
    o_ref[...] = x_ref[...] * w_ref[...] + b_ref[...]


def _linear1_natural(x, w_row, b_row, n, d, budget):
    # Column tile: full D when it fits; otherwise a multiple of 128 so interior
    # column blocks store unmasked and only the last one is masked.
    if d <= 2048:
        tile_d = d
    else:
        tile_d = 1024
    # Row tile ~budget bytes of output; multiple of 8 so the ragged last row
    # block is handled by masking.  Cap keeps the lane-padded x block small.
    tile_n = budget // (4 * tile_d)
    tile_n = max(8, min(4096, tile_n // 8 * 8))
    if tile_n >= n:
        tile_n = n
    grid_n = pl.cdiv(n, tile_n)
    grid_d = pl.cdiv(d, tile_d)
    # Give v7x's two TensorCores >= 2 parallel grid steps when worthwhile.
    if grid_n * grid_d == 1 and n >= 16 and 4 * n * d >= _MIN_SPLIT_BYTES:
        tile_n = _round_up(pl.cdiv(n, 2), 8)
        grid_n = pl.cdiv(n, tile_n)

    return pl.pallas_call(
        _natural_kernel,
        out_shape=jax.ShapeDtypeStruct((n, d), x.dtype),
        grid_spec=pl.GridSpec(
            grid=(grid_n, grid_d),
            in_specs=[
                pl.BlockSpec((tile_n, 1), lambda i, j: (i, 0)),
                pl.BlockSpec((1, tile_d), lambda i, j: (0, j)),
                pl.BlockSpec((1, tile_d), lambda i, j: (0, j)),
            ],
            out_specs=pl.BlockSpec((tile_n, tile_d), lambda i, j: (i, j)),
        ),
        compiler_params=pltpu.CompilerParams(
            dimension_semantics=("parallel", "parallel"),
            vmem_limit_bytes=_VMEM_LIMIT),
        cost_estimate=pl.CostEstimate(
            flops=2 * n * d, transcendentals=0,
            bytes_accessed=4 * (n + 2 * d + n * d)),
    )(x, w_row, b_row)


# ---------------------------------------------------------------------------
# Kernel 2: tiny D (< 32) lane-dense layout.
#   x2d : (rows, LANE)       block (TILE_R, LANE)       index (i, 0)
#   w,b : (D, 1, 1)          resident                   index (0, 0, 0)
#   out : (D, rows, LANE)    block (D, TILE_R, LANE)    index (0, i, 0)
# ---------------------------------------------------------------------------
def _dense_kernel(x_ref, w_ref, b_ref, o_ref):
    # (1, TILE_R, LANE) * (D, 1, 1) + (D, 1, 1) -> (D, TILE_R, LANE); pure VPU.
    o_ref[...] = x_ref[...][None, :, :] * w_ref[...] + b_ref[...]


def _linear1_small_d(x_flat, weight, bias, n, d, budget):
    n_pad = _round_up(n, _LANE)
    rows = n_pad // _LANE
    x_p = x_flat if n_pad == n else jnp.pad(x_flat, (0, n_pad - n))
    x2d = x_p.reshape(rows, _LANE)
    w3 = weight.reshape(d, 1, 1)
    b3 = bias.reshape(d, 1, 1)

    tile_r = budget // (4 * d * _LANE)
    tile_r = max(8, tile_r // 8 * 8)
    if tile_r >= rows:
        tile_r = rows
    grid_r = pl.cdiv(rows, tile_r)
    # >= 2 grid steps along the parallel axis for v7x's two TensorCores.
    if grid_r == 1 and rows >= 16 and 4 * n * d >= _MIN_SPLIT_BYTES:
        tile_r = _round_up(pl.cdiv(rows, 2), 8)
        grid_r = pl.cdiv(rows, tile_r)

    out = pl.pallas_call(
        _dense_kernel,
        out_shape=jax.ShapeDtypeStruct((d, rows, _LANE), x_flat.dtype),
        grid_spec=pl.GridSpec(
            grid=(grid_r,),
            in_specs=[
                pl.BlockSpec((tile_r, _LANE), lambda i: (i, 0)),
                pl.BlockSpec((d, 1, 1), lambda i: (0, 0, 0)),
                pl.BlockSpec((d, 1, 1), lambda i: (0, 0, 0)),
            ],
            out_specs=pl.BlockSpec((d, tile_r, _LANE), lambda i: (0, i, 0)),
        ),
        compiler_params=pltpu.CompilerParams(
            dimension_semantics=("parallel",),
            vmem_limit_bytes=_VMEM_LIMIT),
        cost_estimate=pl.CostEstimate(
            flops=2 * n * d, transcendentals=0,
            bytes_accessed=4 * (n + 2 * d + n * d)),
    )(x2d, w3, b3)

    out2 = out.reshape(d, rows * _LANE)
    if n_pad != n:
        out2 = out2[:, :n]
    # (D, N) -> (N, D).  For D == 1 this is a free reshape; for 1 < D < 32 we
    # accept the materialized transpose over lane-sparse (masked) stores.
    return out2.T


def s0_forward(x, weight, bias):
    """S_0 forward: x (N, 1) f32, weight (D, 1) (PyTorch layout), bias (D,)."""
    n = x.shape[0]
    d = weight.shape[0]
    w_row = weight.reshape(1, d)   # == weight.T since in_features == 1
    b_row = bias.reshape(1, d)

    if n * d < _SMALL_FALLBACK_ELEMS:
        # Small problem: XLA's fused broadcast-FMA already hits the roofline.
        return x * w_row + b_row

    budget = _block_budget_bytes()
    if d < _DENSE_D_MAX:
        return _linear1_small_d(x.reshape(n), weight, bias, n, d, budget)
    return _linear1_natural(x, w_row, b_row, n, d, budget)


if __name__ == "__main__":
    key = jax.random.PRNGKey(0)

    # (N, D) cases covering every dispatch path:
    cases = [
        (8, 1),         # module default; tiny -> jnp fallback
        (300, 200),     # below Pallas threshold -> jnp fallback
        (262144, 1),    # dense tiny-D path, D == 1, multi-step grid
        (130000, 2),    # dense tiny-D path, padded N + ragged row blocks
        (16384, 16),    # dense tiny-D path, D = 16
        (8192, 48),     # natural path, D < 128 (full-D masked lanes), 2-step grid
        (4096, 256),    # natural path, aligned shapes, 2-step parallel grid
        (1030, 256),    # natural path, ragged N handled by block masking
        (513, 640),     # natural path, ragged N, D multiple of 128
    ]

    ok = True
    for (n, d) in cases:
        k_x, k_w, k_b, key = jax.random.split(key, 4)
        # PyTorch Linear(1, d) parameter shapes; init range U(-1, 1) (1/sqrt(1)=1)
        weight = jax.random.uniform(k_w, (d, 1), jnp.float32, -1.0, 1.0)
        bias = jax.random.uniform(k_b, (d,), jnp.float32, -1.0, 1.0)
        x = jax.random.normal(k_x, (n, 1), jnp.float32)

        y = jax.block_until_ready(s0_forward(x, weight, bias))
        y_ref = x @ weight.T + bias

        if y.shape != (n, d) or not jnp.allclose(y, y_ref, atol=1e-5, rtol=1e-5):
            ok = False
            print(f"MISMATCH for (N={n}, D={d}): "
                  f"max_abs_err={float(jnp.max(jnp.abs(y - y_ref)))}")

    if ok:
        print("KERNEL_OK")
</pallas_src>

<mosaic_0001>
module attributes {stable_mosaic.version = 11 : i64} {
  func.func @_dense_kernel(%arg0: i32, %arg1: memref<256x512xf32, #tpu.memory_space<vmem>>, %arg2: memref<1x1x1xf32, #tpu.memory_space<vmem>>, %arg3: memref<1x1x1xf32, #tpu.memory_space<vmem>>, %arg4: memref<1x256x512xf32, #tpu.memory_space<vmem>>) attributes {dimension_semantics = [#tpu.dimension_semantics<parallel>], iteration_bounds = array<i64: 2>, scalar_prefetch = 0 : i64, scratch_operands = 0 : i64, tpu.core_type = #tpu.core_type<tc>, window_params = [{transform_indices = @transform_0, window_bounds = array<i64: 256, 512>}, {pipeline_mode = #tpu.pipeline_mode<synchronous>, transform_indices = @transform_1, window_bounds = array<i64: 1, 1, 1>}, {pipeline_mode = #tpu.pipeline_mode<synchronous>, transform_indices = @transform_2, window_bounds = array<i64: 1, 1, 1>}, {transform_indices = @transform_3, window_bounds = array<i64: 1, 256, 512>}]} {
    %c0 = arith.constant 0 : index
    %c0_0 = arith.constant 0 : index
    %0 = vector.load %arg1[%c0, %c0_0] : memref<256x512xf32, #tpu.memory_space<vmem>>, vector<256x512xf32>
    %1 = vector.shape_cast %0 : vector<256x512xf32> to vector<1x256x512xf32>
    %c0_1 = arith.constant 0 : index
    %c0_2 = arith.constant 0 : index
    %c0_3 = arith.constant 0 : index
    %2 = vector.load %arg2[%c0_1, %c0_2, %c0_3] : memref<1x1x1xf32, #tpu.memory_space<vmem>>, vector<1x1x1xf32>
    %3 = vector.broadcast %2 : vector<1x1x1xf32> to vector<1x256x512xf32>
    %4 = arith.mulf %1, %3 : vector<1x256x512xf32>
    %c0_4 = arith.constant 0 : index
    %c0_5 = arith.constant 0 : index
    %c0_6 = arith.constant 0 : index
    %5 = vector.load %arg3[%c0_4, %c0_5, %c0_6] : memref<1x1x1xf32, #tpu.memory_space<vmem>>, vector<1x1x1xf32>
    %6 = vector.broadcast %5 : vector<1x1x1xf32> to vector<1x256x512xf32>
    %7 = arith.addf %4, %6 : vector<1x256x512xf32>
    %c0_7 = arith.constant 0 : index
    %c0_8 = arith.constant 0 : index
    %c0_9 = arith.constant 0 : index
    %8 = vector.load %arg4[%c0_7, %c0_8, %c0_9] : memref<1x256x512xf32, #tpu.memory_space<vmem>>, vector<1x256x512xf32>
    tpu.vector_store %arg4[%c0_7, %c0_8, %c0_9], %7 {strides = array<i32>} : memref<1x256x512xf32, #tpu.memory_space<vmem>>, vector<1x256x512xf32>,
    return
  }
  func.func @transform_0(%arg0: i32) -> (i32, i32) {
    %c0_i32 = arith.constant 0 : i32
    %c0_i32_0 = arith.constant 0 : i32
    return %arg0, %c0_i32 : i32, i32
  }
  func.func @transform_1(%arg0: i32) -> (i32, i32, i32) {
    %c0_i32 = arith.constant 0 : i32
    %c0_i32_0 = arith.constant 0 : i32
    %c0_i32_1 = arith.constant 0 : i32
    %c0_i32_2 = arith.constant 0 : i32
    return %c0_i32, %c0_i32_0, %c0_i32_1 : i32, i32, i32
  }
  func.func @transform_2(%arg0: i32) -> (i32, i32, i32) {
    %c0_i32 = arith.constant 0 : i32
    %c0_i32_0 = arith.constant 0 : i32
    %c0_i32_1 = arith.constant 0 : i32
    %c0_i32_2 = arith.constant 0 : i32
    return %c0_i32, %c0_i32_0, %c0_i32_1 : i32, i32, i32
  }
  func.func @transform_3(%arg0: i32) -> (i32, i32, i32) {
    %c0_i32 = arith.constant 0 : i32
    %c0_i32_0 = arith.constant 0 : i32
    %c0_i32_1 = arith.constant 0 : i32
    return %c0_i32, %arg0, %c0_i32_0 : i32, i32, i32
  }
}

</mosaic_0001>

<bundles_post_ra>
// kernel: tpu_custom_call.1
= control target key start
LH: loop header
LB: loop body
LE: loop exit
PB: predicated region body
PF: predicated region fallthrough
CT: control target
= control target key end

     0   :  { %s2092_s0 = inlined_call_operand.hbm [shape: f32[512,512], index: 0, kind: input, shape index: {}]   ;;  %s2093_s1 = inlined_call_operand.<no memory space> [shape: f32[1,1,1], index: 1, kind: input, shape index: {}]   ;;  %s2094_s3 = inlined_call_operand.hbm [shape: f32[1,512,512], index: 3, kind: output, shape index: {}]   ;;  %s2095_s2 = inlined_call_operand.<no memory space> [shape: f32[1,1,1], index: 2, kind: input, shape index: {}]  }
   0x1   :  { %v8_v0 = vstv %s2093_s1  ;;  %v10_v1 = vstv %s2095_s2 }
   0x2   :  { %9 = vst [vmem:[#allocation2] sm:$0x1] %v8_v0  ;;  %11 = vst [vmem:[#allocation3] sm:$0x1] %v10_v1 }
   0x3   :  { %12 = vsyncpa [#allocation5], 0 }
   0x4   :  { %14 = vsyncpa [#allocation5 + $0x1], 0 }
   0x5   :  { %15 = vsyncpa [#allocation6], 0 }
   0x6   :  { %17 = vsyncpa [#allocation6 + $0x1], 0  ;;  %s1021_s16 = smov 0   ;;  %s1023_s17 = smov 0  }
   0x7   :  { %s1025_s18 = smov 0   ;;  %s1027_s19 = smov 0  }
   0x8 LB: > { %s1042_s1 = sadd.s32 4294967295, %s986_s19   ;;  %s816_s2 = sadd.s32 4294967294, %s986_s19   ;;  %s986_s19 = sphi %s1027_s19, %s2254_s19   ;;  %s982_s18 = sphi %s1025_s18, %s2253_s18   ;;  %s978_s17 = sphi %s1023_s17, %s2252_s17   ;;  %s974_s16 = sphi %s1021_s16, %s2251_s16  }
   0x9   : > { %s1046_s20 = sadd.s32 1, %s986_s19   ;;  %s30_s21 = sadd.s32 1, %s982_s18 }
   0xa   : > { %s27_s22 = ssub.s32 %s986_s19, %s1046_s20  ;;  %p37_p0 = scmp.ne.s32.totalorder %s982_s18, %s978_s17 }
   0xb   : > { %p28_p1 = scmp.eq.s32.totalorder %s27_s22, 0  ;;  %p38_p2 = scmp.eq.s32.totalorder %s986_s19, 0 }
   0xc   : > { %p43_p3 = scmp.ne.s32.totalorder %s978_s17, %s974_s16  ;;  %p44_p4 = scmp.eq.s32.totalorder %s1042_s1, 0 }
   0xd   : > { %s1058_s23 = scalar_select %p28_p1, %s982_s18, %s30_s21  }
   0xe   : > { %p1060_p5 = por %p38_p2, %p37_p0  ;;  %p1064_p6 = por %p44_p4, %p43_p3 }
   0xf   : > { %p109_p7 = scmp.eq.s32.totalorder %s1042_s1, 1  ;;  %p115_p8 = scmp.eq.s32.totalorder %s816_s2, 1 }
  0x10   : > { %p850_p10 = scmp.lt.s32.totalorder %s986_s19, 2  ;;  %s141_s28 = sand.u32 1, %s982_s18  }
  0x11   : > { %p1071_p11 = por %p109_p7, %p37_p0  ;;  %p1075_p12 = por %p115_p8, %p43_p3 }
  0x12   : > { %s835_s29 = sshll.u32 %s986_s19, 14  ;;  %s819_s30 = sshll.u32 %s141_s28, 10 }
  0x13   : > { %s2099_s26 = scalar_select %p1071_p11, 1, 0 }
  0x14   : > { %s2100_s27 = scalar_select %p1075_p12, 1, 0 }
  0x15   : > { %s1084_s6 = scalar_lea.hbm %s2092_s0, %s835_s29  ;;  %s145_s7 = scalar_lea.vmem [#allocation4], %s819_s30 }
  0x16   : > { %s153_s8 = sshll.u32 %s145_s7, 4  ;;  %p1088_p13 = pnand %p850_p10, %p1060_p5  ;;  %s1092_s8 = int_to_ptr.vmem [resolvable:$true] %s153_s8 }
  0x17   : > { %s1094_s10 = scalar_lea.sflag [#allocation5], %s141_s28  ;;  %s890_s11 = scalar_lea.hbm %s1084_s6, 16384 }
  0x18   : > { %p891_p0 = scmp.ne.s32.totalorder %s1084_s6, %s890_s11  ;;  %p892_p1 = pneg %p1088_p13 }
  0x19   : > { %s895_s14 = scalar_lea.hbm %s2092_s0, 32768  ;;  %p896_p4 = scmp.lt.u32.totalorder %s1084_s6, %s2092_s0 }
  0x1a   : > { %p893_p2 = pnand %p892_p1, %p891_p0  ;;  %p897_p5 = scmp.lt.u32.totalorder %s895_s14, %s890_s11 }
  0x1b   : > { %p899_p8 = scmp.lt.u32.totalorder %s890_s11, %s1084_s6 }
  0x1c   : > { %p894_p3 = pneg %p893_p2  ;;  %p898_p7 = por %p897_p5, %p896_p4 }
  0x1e   : > { %p900_p10 = por %p899_p8, %p898_p7 }
  0x20   : > { %p901_p9 = pnand %p900_p10, %p894_p3 }
  0x22   : > { %904 = shalt.err (!%p901_p9)
}
  0x23   : > { %s905_s21 = scalar_lea.vmem %s1092_s8, 16384  ;;  %s988_s22 = smov [#allocation4]  }
  0x24   : > { %p906_p0 = scmp.ne.s32.totalorder %s1092_s8, %s905_s21  ;;  %s910_s24 = sshll.u32 %s988_s22, 4  ;;  %s911_s24 = int_to_ptr.vmem [resolvable:$false] %s910_s24 }
  0x25   : > { %s912_s28 = scalar_lea.vmem %s911_s24, 32768  ;;  %p913_p11 = scmp.lt.s32.totalorder %s1092_s8, %s911_s24 }
  0x26   : > { %p908_p2 = pnand %p906_p0, %p892_p1  ;;  %p914_p4 = scmp.lt.s32.totalorder %s912_s28, %s905_s21 }
  0x28   : > { %p909_p12 = pneg %p908_p2  ;;  %p915_p5 = por %p914_p4, %p913_p11 }
  0x2a   : > { %p916_p7 = pnand %p915_p5, %p909_p12 }
  0x2c   : > { %919 = shalt.err (!%p916_p7)
}
  0x2d   : > { %s989_s29 = smov 512   ;;  %s990_s30 = smov 32  }
  0x2e   : > { %845 = dma.hbm_to_vmem [thread:$0]  (!%p1088_p13), %s1084_s6, 16384, %s1092_s8, %s1094_s10, %s989_s29, %s989_s29, %s990_s30  }
  0x2f   : > { %p823_p9 = scmp.ge.s32.totalorder %s986_s19, 1  ;;  %p161_p1 = scmp.lt.s32.totalorder %s986_s19, 3 }
  0x31   : > { %p162_p3 = pnand %p823_p9, %p161_p1 }
  0x33   : > { %165 = sbr.rel (%p162_p3) target bundleno = 318 (0x13e), region = 32 }
  0x3a   : > { %s1125_s4 = sand.u32 1, %s978_s17  }
  0x3b   : > { %s824_s5 = sshll.u32 %s1125_s4, 10  ;;  %s168_s7 = scalar_lea.sflag [#allocation5], %s1125_s4 }
  0x3c   : > { %s1131_s11 = scalar_lea.vmem [#allocation4], %s824_s5 }
  0x3d   : > { %965 = dma.done.wait (%p1064_p6), %s168_s7, 16384  }
  0x3e   : > { %967 = vsyncadd (%p1064_p6), %s168_s7, 4294950912  ;;  %v991_v2 = vmov 0   ;;  %v826_v3 = vld [vmem:[#allocation2] ss:$0 sm:$0xff]  ;;  %v827_v4 = vld [vmem:[#allocation3] ss:$0 sm:$0xff] }
  0x3f   : > { %889 = vset.pattern.permute.xlu0 %v991_v2  ;;  %v196_v5 = vld [vmem:[%s1131_s11] sm:$0xff]  ;;  %v197_v6 = vld [vmem:[%s1131_s11 + $0x8] sm:$0xff]  ;;  %v198_v7 = vld [vmem:[%s1131_s11 + $0x10] sm:$0xff]  ;;  %s1679_s25 = scalar_lea.vmem [#allocation7], %s824_s5  ;;  %s837_s6 = sshll.u32 %s1042_s1, 14 }
  0x40   : > { %331 = vperm.xlu0 %889, %v826_v3   ;;  %v199_v8 = vld [vmem:[%s1131_s11 + $0x18] sm:$0xff]  ;;  %v200_v9 = vld [vmem:[%s1131_s11 + $0x20] sm:$0xff]  ;;  %v201_v10 = vld [vmem:[%s1131_s11 + $0x28] sm:$0xff]  ;;  %s743_s8 = sshll.u32 %s1679_s25, 4  ;;  %s2026_s10 = scalar_lea.hbm %s2094_s3, %s837_s6  ;;  %s2028_s8 = int_to_ptr.vmem [resolvable:$true] %s743_s8 }
  0x41   : > { %v202_v11 = vld [vmem:[%s1131_s11 + $0x30] sm:$0xff]  ;;  %v203_v12 = vld [vmem:[%s1131_s11 + $0x38] sm:$0xff]  ;;  %v204_v13 = vld [vmem:[%s1131_s11 + $0x40] sm:$0xff]  ;;  %s729_s12 = scalar_lea.sflag [#allocation6], %s1125_s4  ;;  %s920_s13 = scalar_lea.vmem %s2028_s8, 16384 }
  0x42   : > { %v205_v14 = vld [vmem:[%s1131_s11 + $0x48] sm:$0xff]  ;;  %v206_v15 = vld [vmem:[%s1131_s11 + $0x50] sm:$0xff]  ;;  %v207_v16 = vld [vmem:[%s1131_s11 + $0x58] sm:$0xff]  ;;  %p921_p6 = scmp.ne.s32.totalorder %s2028_s8, %s920_s13  ;;  %p2248_p11 = scmp.ne.s32.totalorder %s2099_s26, 0 }
  0x43   : > { %v208_v17 = vld [vmem:[%s1131_s11 + $0x60] sm:$0xff]  ;;  %v209_v18 = vld [vmem:[%s1131_s11 + $0x68] sm:$0xff]  ;;  %v210_v19 = vld [vmem:[%s1131_s11 + $0x70] sm:$0xff]  ;;  %s992_s14 = smov [#allocation7]  }
  0x44   : > { %469 = vperm.xlu0 %889, %v827_v4   ;;  %v211_v20 = vld [vmem:[%s1131_s11 + $0x78] sm:$0xff]  ;;  %v212_v22 = vld [vmem:[%s1131_s11 + $0x80] sm:$0xff]  ;;  %v213_v23 = vld [vmem:[%s1131_s11 + $0x88] sm:$0xff]  ;;  %p922_p12 = pnand %p921_p6, %p2248_p11  ;;  %s924_s15 = sshll.u32 %s992_s14, 4  ;;  %s925_s15 = int_to_ptr.vmem [resolvable:$false] %s924_s15 }
  0x45   : > { %v214_v24 = vld [vmem:[%s1131_s11 + $0x90] sm:$0xff]  ;;  %v215_v25 = vld [vmem:[%s1131_s11 + $0x98] sm:$0xff]  ;;  %v216_v26 = vld [vmem:[%s1131_s11 + $0xa0] sm:$0xff]  ;;  %s926_s2 = scalar_lea.vmem %s925_s15, 32768  ;;  %p927_p8 = scmp.lt.s32.totalorder %s2028_s8, %s925_s15 }
  0x46   : > { %v217_v27 = vld [vmem:[%s1131_s11 + $0xa8] sm:$0xff]  ;;  %v218_v28 = vld [vmem:[%s1131_s11 + $0xb0] sm:$0xff]  ;;  %v219_v29 = vld [vmem:[%s1131_s11 + $0xb8] sm:$0xff]  ;;  %p923_p13 = pneg %p922_p12  ;;  %p928_p10 = scmp.lt.s32.totalorder %s926_s2, %s920_s13 }
  0x47   : > { %v220_v34 = vld [vmem:[%s1131_s11 + $0xc0] sm:$0xff]  ;;  %v221_v35 = vld [vmem:[%s1131_s11 + $0xc8] sm:$0xff]  ;;  %v222_v36 = vld [vmem:[%s1131_s11 + $0xd0] sm:$0xff] }
  0x48   : > { %v223_v37 = vld [vmem:[%s1131_s11 + $0xd8] sm:$0xff]  ;;  %v224_v42 = vld [vmem:[%s1131_s11 + $0xe0] sm:$0xff]  ;;  %v225_v43 = vld [vmem:[%s1131_s11 + $0xe8] sm:$0xff]  ;;  %p929_p0 = por %p928_p10, %p927_p8 }
  0x49   : > { %v226_v44 = vld [vmem:[%s1131_s11 + $0xf0] sm:$0xff]  ;;  %v227_v45 = vld [vmem:[%s1131_s11 + $0xf8] sm:$0xff]  ;;  %v228_v50 = vld [vmem:[%s1131_s11 + $0x100] sm:$0xff] }
  0x4a   : > { %v229_v51 = vld [vmem:[%s1131_s11 + $0x108] sm:$0xff]  ;;  %v230_v52 = vld [vmem:[%s1131_s11 + $0x110] sm:$0xff]  ;;  %v231_v53 = vld [vmem:[%s1131_s11 + $0x118] sm:$0xff]  ;;  %p930_p2 = pnand %p929_p0, %p923_p13 }
  0x4b   : > { %v232_v58 = vld [vmem:[%s1131_s11 + $0x120] sm:$0xff]  ;;  %v233_v59 = vld [vmem:[%s1131_s11 + $0x128] sm:$0xff]  ;;  %v234_v60 = vld [vmem:[%s1131_s11 + $0x130] sm:$0xff] }
  0x4c   : > { %v235_v61 = vld [vmem:[%s1131_s11 + $0x138] sm:$0xff]  ;;  %v236_v2 = vld [vmem:[%s1131_s11 + $0x140] sm:$0xff]  ;;  %v237_v3 = vld [vmem:[%s1131_s11 + $0x148] sm:$0xff] }
  0x4d   : > { %v238_v4 = vld [vmem:[%s1131_s11 + $0x150] sm:$0xff] }
  0xbf   : > { %v1153_v21 = vpop.permute.xlu0 %331 }
  0xc0   : > { %v1164_v30 = vmul.f32 %v1153_v21, %v196_v5  ;;  %v1167_v31 = vmul.f32 %v1153_v21, %v197_v6  ;;  %v1170_v32 = vmul.f32 %v1153_v21, %v198_v7  ;;  %v1173_v33 = vmul.f32 %v1153_v21, %v199_v8  ;;  %v239_v5 = vld [vmem:[%s1131_s11 + $0x158] sm:$0xff] }
  0xc1   : > { %v1180_v38 = vmul.f32 %v1153_v21, %v200_v9  ;;  %v1183_v39 = vmul.f32 %v1153_v21, %v201_v10  ;;  %v1186_v40 = vmul.f32 %v1153_v21, %v202_v11  ;;  %v1189_v41 = vmul.f32 %v1153_v21, %v203_v12  ;;  %v240_v10 = vld [vmem:[%s1131_s11 + $0x160] sm:$0xff]  ;;  %v241_v11 = vld [vmem:[%s1131_s11 + $0x168] sm:$0xff]  ;;  %v242_v12 = vld [vmem:[%s1131_s11 + $0x170] sm:$0xff] }
  0xc2   : > { %v1196_v46 = vmul.f32 %v1153_v21, %v204_v13  ;;  %v1199_v47 = vmul.f32 %v1153_v21, %v205_v14  ;;  %v1202_v48 = vmul.f32 %v1153_v21, %v206_v15  ;;  %v1205_v49 = vmul.f32 %v1153_v21, %v207_v16  ;;  %v243_v13 = vld [vmem:[%s1131_s11 + $0x178] sm:$0xff] }
  0xc3   : > { %v1212_v54 = vmul.f32 %v1153_v21, %v208_v17  ;;  %v1215_v55 = vmul.f32 %v1153_v21, %v209_v18  ;;  %v1218_v56 = vmul.f32 %v1153_v21, %v210_v19  ;;  %v1221_v57 = vmul.f32 %v1153_v21, %v211_v20  ;;  %v244_v18 = vld [vmem:[%s1131_s11 + $0x180] sm:$0xff]  ;;  %v245_v19 = vld [vmem:[%s1131_s11 + $0x188] sm:$0xff]  ;;  %v246_v20 = vld [vmem:[%s1131_s11 + $0x190] sm:$0xff] }
  0xc4   : > { %v1228_v62 = vmul.f32 %v1153_v21, %v212_v22  ;;  %v1231_v63 = vmul.f32 %v1153_v21, %v213_v23  ;;  %v1234_v0 = vmul.f32 %v1153_v21, %v214_v24  ;;  %v1237_v1 = vmul.f32 %v1153_v21, %v215_v25  ;;  %v247_v22 = vld [vmem:[%s1131_s11 + $0x198] sm:$0xff] }
  0xc5   : > { %v1244_v6 = vmul.f32 %v1153_v21, %v216_v26  ;;  %v1247_v7 = vmul.f32 %v1153_v21, %v217_v27  ;;  %v1250_v8 = vmul.f32 %v1153_v21, %v218_v28  ;;  %v1253_v9 = vmul.f32 %v1153_v21, %v219_v29  ;;  %v248_v27 = vld [vmem:[%s1131_s11 + $0x1a0] sm:$0xff]  ;;  %v249_v28 = vld [vmem:[%s1131_s11 + $0x1a8] sm:$0xff]  ;;  %v250_v29 = vld [vmem:[%s1131_s11 + $0x1b0] sm:$0xff] }
  0xc6   : > { %v1260_v14 = vmul.f32 %v1153_v21, %v220_v34  ;;  %v1263_v15 = vmul.f32 %v1153_v21, %v221_v35  ;;  %v1266_v16 = vmul.f32 %v1153_v21, %v222_v36  ;;  %v1269_v17 = vmul.f32 %v1153_v21, %v223_v37  ;;  %v251_v34 = vld [vmem:[%s1131_s11 + $0x1b8] sm:$0xff] }
  0xc7   : > { %v1276_v23 = vmul.f32 %v1153_v21, %v224_v42  ;;  %v1279_v24 = vmul.f32 %v1153_v21, %v225_v43  ;;  %v1282_v25 = vmul.f32 %v1153_v21, %v226_v44  ;;  %v1285_v26 = vmul.f32 %v1153_v21, %v227_v45  ;;  %v252_v43 = vld [vmem:[%s1131_s11 + $0x1c0] sm:$0xff]  ;;  %v253_v44 = vld [vmem:[%s1131_s11 + $0x1c8] sm:$0xff]  ;;  %v254_v45 = vld [vmem:[%s1131_s11 + $0x1d0] sm:$0xff] }
  0xc8   : > { %v1292_v35 = vmul.f32 %v1153_v21, %v228_v50  ;;  %v1295_v36 = vmul.f32 %v1153_v21, %v229_v51  ;;  %v1298_v37 = vmul.f32 %v1153_v21, %v230_v52  ;;  %v1301_v42 = vmul.f32 %v1153_v21, %v231_v53 }
  0xc9   : > { %2102 = vst [vmem:[#allocation10_spill] sm:$0xff] %v1282_v25  ;;  %2103 = vst [vmem:[#allocation11_spill] sm:$0xff] %v1285_v26  ;;  %v255_v26 = vld [vmem:[%s1131_s11 + $0x1d8] sm:$0xff]  ;;  %v1308_v50 = vmul.f32 %v1153_v21, %v232_v58  ;;  %v1311_v51 = vmul.f32 %v1153_v21, %v233_v59  ;;  %v1314_v52 = vmul.f32 %v1153_v21, %v234_v60 }
  0xca   : > { %2104 = vst [vmem:[#allocation12_spill] sm:$0xff] %v1292_v35  ;;  %2105 = vst [vmem:[#allocation13_spill] sm:$0xff] %v1295_v36  ;;  %v1317_v53 = vmul.f32 %v1153_v21, %v235_v61  ;;  %v258_v36 = vld [vmem:[%s1131_s11 + $0x1f0] sm:$0xff]  ;;  %v259_v35 = vld [vmem:[%s1131_s11 + $0x1f8] sm:$0xff]  ;;  %v1324_v58 = vmul.f32 %v1153_v21, %v236_v2  ;;  %v1327_v59 = vmul.f32 %v1153_v21, %v237_v3 }
  0xcb   : > { %2106 = vst [vmem:[#allocation14_spill] sm:$0xff] %v1298_v37  ;;  %2107 = vst [vmem:[#allocation15_spill] sm:$0xff] %v1301_v42  ;;  %v256_v42 = vld [vmem:[%s1131_s11 + $0x1e0] sm:$0xff]  ;;  %v257_v37 = vld [vmem:[%s1131_s11 + $0x1e8] sm:$0xff]  ;;  %v1330_v60 = vmul.f32 %v1153_v21, %v238_v4  ;;  %v1333_v61 = vmul.f32 %v1153_v21, %v239_v5  ;;  %v1340_v2 = vmul.f32 %v1153_v21, %v240_v10 }
  0xcc   : > { %2108 = vst [vmem:[#allocation16_spill] sm:$0xff] %v1308_v50  ;;  %2109 = vst [vmem:[#allocation17_spill] sm:$0xff] %v1311_v51  ;;  %v262_v51 = vld [vmem:[%s1131_s11 + $0x210] sm:$0xff]  ;;  %v263_v50 = vld [vmem:[%s1131_s11 + $0x218] sm:$0xff]  ;;  %v1343_v3 = vmul.f32 %v1153_v21, %v241_v11  ;;  %v1346_v4 = vmul.f32 %v1153_v21, %v242_v12  ;;  %v1349_v5 = vmul.f32 %v1153_v21, %v243_v13 }
  0xcd   : > { %2110 = vst [vmem:[#allocation18_spill] sm:$0xff] %v1314_v52  ;;  %2111 = vst [vmem:[#allocation19_spill] sm:$0xff] %v1317_v53  ;;  %v260_v53 = vld [vmem:[%s1131_s11 + $0x200] sm:$0xff]  ;;  %v261_v52 = vld [vmem:[%s1131_s11 + $0x208] sm:$0xff]  ;;  %v1356_v10 = vmul.f32 %v1153_v21, %v244_v18  ;;  %v1359_v11 = vmul.f32 %v1153_v21, %v245_v19  ;;  %v1362_v12 = vmul.f32 %v1153_v21, %v246_v20 }
  0xce   : > { %2112 = vst [vmem:[#allocation20_spill] sm:$0xff] %v1324_v58  ;;  %2113 = vst [vmem:[#allocation21_spill] sm:$0xff] %v1327_v59  ;;  %v266_v59 = vld [vmem:[%s1131_s11 + $0x230] sm:$0xff]  ;;  %v267_v58 = vld [vmem:[%s1131_s11 + $0x238] sm:$0xff]  ;;  %v1365_v13 = vmul.f32 %v1153_v21, %v247_v22  ;;  %v1372_v18 = vmul.f32 %v1153_v21, %v248_v27  ;;  %v1375_v19 = vmul.f32 %v1153_v21, %v249_v28 }
  0xcf   : > { %2114 = vst [vmem:[#allocation22_spill] sm:$0xff] %v1330_v60  ;;  %2115 = vst [vmem:[#allocation23_spill] sm:$0xff] %v1333_v61  ;;  %v264_v61 = vld [vmem:[%s1131_s11 + $0x220] sm:$0xff]  ;;  %v265_v60 = vld [vmem:[%s1131_s11 + $0x228] sm:$0xff]  ;;  %v1378_v20 = vmul.f32 %v1153_v21, %v250_v29  ;;  %v1381_v22 = vmul.f32 %v1153_v21, %v251_v34  ;;  %v1388_v27 = vmul.f32 %v1153_v21, %v252_v43 }
  0xd0   : > { %2116 = vst [vmem:[#allocation24_spill] sm:$0xff] %v1340_v2  ;;  %2117 = vst [vmem:[#allocation25_spill] sm:$0xff] %v1343_v3  ;;  %v270_v3 = vld [vmem:[%s1131_s11 + $0x250] sm:$0xff]  ;;  %v271_v2 = vld [vmem:[%s1131_s11 + $0x258] sm:$0xff]  ;;  %v1391_v28 = vmul.f32 %v1153_v21, %v253_v44  ;;  %v1394_v29 = vmul.f32 %v1153_v21, %v254_v45  ;;  %v1397_v34 = vmul.f32 %v1153_v21, %v255_v26 }
  0xd1   : > { %2118 = vst [vmem:[#allocation26_spill] sm:$0xff] %v1346_v4  ;;  %2119 = vst [vmem:[#allocation27_spill] sm:$0xff] %v1349_v5  ;;  %v268_v5 = vld [vmem:[%s1131_s11 + $0x240] sm:$0xff]  ;;  %v269_v4 = vld [vmem:[%s1131_s11 + $0x248] sm:$0xff]  ;;  %v1404_v43 = vmul.f32 %v1153_v21, %v256_v42  ;;  %v1407_v44 = vmul.f32 %v1153_v21, %v257_v37  ;;  %v1410_v45 = vmul.f32 %v1153_v21, %v258_v36 }
  0xd2   : > { %2120 = vst [vmem:[#allocation28_spill] sm:$0xff] %v1356_v10  ;;  %2121 = vst [vmem:[#allocation29_spill] sm:$0xff] %v1359_v11  ;;  %v274_v11 = vld [vmem:[%s1131_s11 + $0x270] sm:$0xff]  ;;  %v275_v10 = vld [vmem:[%s1131_s11 + $0x278] sm:$0xff]  ;;  %v1413_v26 = vmul.f32 %v1153_v21, %v259_v35  ;;  %v1420_v42 = vmul.f32 %v1153_v21, %v260_v53  ;;  %v1423_v37 = vmul.f32 %v1153_v21, %v261_v52 }
  0xd3   : > { %2122 = vst [vmem:[#allocation30_spill] sm:$0xff] %v1362_v12  ;;  %2123 = vst [vmem:[#allocation31_spill] sm:$0xff] %v1365_v13  ;;  %v272_v13 = vld [vmem:[%s1131_s11 + $0x260] sm:$0xff]  ;;  %v273_v12 = vld [vmem:[%s1131_s11 + $0x268] sm:$0xff]  ;;  %v1426_v36 = vmul.f32 %v1153_v21, %v262_v51  ;;  %v1429_v35 = vmul.f32 %v1153_v21, %v263_v50  ;;  %v1436_v53 = vmul.f32 %v1153_v21, %v264_v61 }
  0xd4   : > { %2124 = vst [vmem:[#allocation32_spill] sm:$0xff] %v1372_v18  ;;  %2125 = vst [vmem:[#allocation33_spill] sm:$0xff] %v1375_v19  ;;  %v278_v19 = vld [vmem:[%s1131_s11 + $0x290] sm:$0xff]  ;;  %v279_v18 = vld [vmem:[%s1131_s11 + $0x298] sm:$0xff]  ;;  %v1439_v52 = vmul.f32 %v1153_v21, %v265_v60  ;;  %v1442_v51 = vmul.f32 %v1153_v21, %v266_v59  ;;  %v1445_v50 = vmul.f32 %v1153_v21, %v267_v58 }
  0xd5   : > { %2126 = vst [vmem:[#allocation34_spill] sm:$0xff] %v1378_v20  ;;  %2127 = vst [vmem:[#allocation35_spill] sm:$0xff] %v1381_v22  ;;  %v276_v22 = vld [vmem:[%s1131_s11 + $0x280] sm:$0xff]  ;;  %v277_v20 = vld [vmem:[%s1131_s11 + $0x288] sm:$0xff]  ;;  %v1452_v61 = vmul.f32 %v1153_v21, %v268_v5  ;;  %v1455_v60 = vmul.f32 %v1153_v21, %v269_v4  ;;  %v1458_v59 = vmul.f32 %v1153_v21, %v270_v3 }
  0xd6   : > { %2128 = vst [vmem:[#allocation36_spill] sm:$0xff] %v1388_v27  ;;  %2129 = vst [vmem:[#allocation37_spill] sm:$0xff] %v1391_v28  ;;  %v282_v28 = vld [vmem:[%s1131_s11 + $0x2b0] sm:$0xff]  ;;  %v283_v27 = vld [vmem:[%s1131_s11 + $0x2b8] sm:$0xff]  ;;  %v1461_v58 = vmul.f32 %v1153_v21, %v271_v2  ;;  %v1468_v25 = vmul.f32 %v1153_v21, %v272_v13  ;;  %v1471_v5 = vmul.f32 %v1153_v21, %v273_v12 }
  0xd7   : > { %2130 = vst [vmem:[#allocation38_spill] sm:$0xff] %v1394_v29  ;;  %2131 = vst [vmem:[#allocation39_spill] sm:$0xff] %v1397_v34  ;;  %v280_v34 = vld [vmem:[%s1131_s11 + $0x2a0] sm:$0xff]  ;;  %v281_v29 = vld [vmem:[%s1131_s11 + $0x2a8] sm:$0xff]  ;;  %v1474_v4 = vmul.f32 %v1153_v21, %v274_v11  ;;  %v1477_v3 = vmul.f32 %v1153_v21, %v275_v10  ;;  %v1487_v13 = vmul.f32 %v1153_v21, %v277_v20 }
  0xd8   : > { %2132 = vst [vmem:[#allocation40_spill] sm:$0xff] %v1404_v43  ;;  %2133 = vst [vmem:[#allocation41_spill] sm:$0xff] %v1407_v44  ;;  %v286_v44 = vld [vmem:[%s1131_s11 + $0x2d0] sm:$0xff]  ;;  %v287_v43 = vld [vmem:[%s1131_s11 + $0x2d8] sm:$0xff]  ;;  %v1490_v12 = vmul.f32 %v1153_v21, %v278_v19  ;;  %v1493_v10 = vmul.f32 %v1153_v21, %v279_v18  ;;  %v1505_v20 = vmul.f32 %v1153_v21, %v282_v28 }
  0xd9   : > { %2134 = vst [vmem:[#allocation42_spill] sm:$0xff] %v1410_v45  ;;  %2135 = vst [vmem:[#allocation43_spill] sm:$0xff] %v1413_v26  ;;  %v284_v26 = vld [vmem:[%s1131_s11 + $0x2c0] sm:$0xff]  ;;  %v285_v45 = vld [vmem:[%s1131_s11 + $0x2c8] sm:$0xff]  ;;  %v1508_v19 = vmul.f32 %v1153_v21, %v283_v27  ;;  %v1523_v28 = vmul.f32 %v1153_v21, %v287_v43 }
  0xda   : > { %2136 = vst [vmem:[#allocation44_spill] sm:$0xff] %v1420_v42  ;;  %2137 = vst [vmem:[#allocation45_spill] sm:$0xff] %v1423_v37  ;;  %v290_v37 = vld [vmem:[%s1131_s11 + $0x2f0] sm:$0xff]  ;;  %v291_v42 = vld [vmem:[%s1131_s11 + $0x2f8] sm:$0xff] }
  0xdb   : > { %2138 = vst [vmem:[#allocation46_spill] sm:$0xff] %v1426_v36  ;;  %2139 = vst [vmem:[#allocation47_spill] sm:$0xff] %v1429_v35  ;;  %v288_v35 = vld [vmem:[%s1131_s11 + $0x2e0] sm:$0xff]  ;;  %v289_v36 = vld [vmem:[%s1131_s11 + $0x2e8] sm:$0xff] }
  0xdc   : > { %2140 = vst [vmem:[#allocation48_spill] sm:$0xff] %v1436_v53  ;;  %2141 = vst [vmem:[#allocation49_spill] sm:$0xff] %v1439_v52  ;;  %v294_v52 = vld [vmem:[%s1131_s11 + $0x310] sm:$0xff]  ;;  %v295_v53 = vld [vmem:[%s1131_s11 + $0x318] sm:$0xff] }
  0xdd   : > { %2142 = vst [vmem:[#allocation50_spill] sm:$0xff] %v1442_v51  ;;  %2143 = vst [vmem:[#allocation51_spill] sm:$0xff] %v1445_v50  ;;  %v292_v50 = vld [vmem:[%s1131_s11 + $0x300] sm:$0xff]  ;;  %v293_v51 = vld [vmem:[%s1131_s11 + $0x308] sm:$0xff] }
  0xde   : > { %2144 = vst [vmem:[#allocation52_spill] sm:$0xff] %v1452_v61  ;;  %2145 = vst [vmem:[#allocation53_spill] sm:$0xff] %v1455_v60  ;;  %v296_v2 = vld [vmem:[%s1131_s11 + $0x320] sm:$0xff]  ;;  %v299_v60 = vld [vmem:[%s1131_s11 + $0x338] sm:$0xff]  ;;  %v1484_v61 = vmul.f32 %v1153_v21, %v276_v22  ;;  %v1502_v22 = vmul.f32 %v1153_v21, %v281_v29  ;;  %v1520_v29 = vmul.f32 %v1153_v21, %v286_v44 }
  0xdf   : > { %2146 = vst [vmem:[#allocation54_spill] sm:$0xff] %v1458_v59  ;;  %2147 = vst [vmem:[#allocation55_spill] sm:$0xff] %v1461_v58  ;;  %v297_v58 = vld [vmem:[%s1131_s11 + $0x328] sm:$0xff]  ;;  %v298_v59 = vld [vmem:[%s1131_s11 + $0x330] sm:$0xff]  ;;  %v1538_v44 = vmul.f32 %v1153_v21, %v291_v42 }
  0xe0   : > { %2148 = vst [vmem:[#allocation56_spill] sm:$0xff] %v1471_v5  ;;  %2149 = vst [vmem:[#allocation57_spill] sm:$0xff] %v1474_v4  ;;  %v300_v11 = vld [vmem:[%s1131_s11 + $0x340] sm:$0xff]  ;;  %v302_v4 = vld [vmem:[%s1131_s11 + $0x350] sm:$0xff]  ;;  %v1499_v5 = vmul.f32 %v1153_v21, %v280_v34  ;;  %v1517_v34 = vmul.f32 %v1153_v21, %v285_v45  ;;  %v1535_v45 = vmul.f32 %v1153_v21, %v290_v37 }
  0xe1   : > { %2150 = vst [vmem:[#allocation58_spill] sm:$0xff] %v1477_v3  ;;  %2151 = vst [vmem:[#allocation59_spill] sm:$0xff] %v1487_v13  ;;  %v301_v3 = vld [vmem:[%s1131_s11 + $0x348] sm:$0xff]  ;;  %v303_v18 = vld [vmem:[%s1131_s11 + $0x358] sm:$0xff]  ;;  %v1514_v13 = vmul.f32 %v1153_v21, %v284_v26  ;;  %v1532_v26 = vmul.f32 %v1153_v21, %v289_v36  ;;  %v1550_v36 = vmul.f32 %v1153_v21, %v294_v52 }
  0xe2   : > { %2152 = vst [vmem:[#allocation60_spill] sm:$0xff] %v1490_v12  ;;  %2153 = vst [vmem:[#allocation61_spill] sm:$0xff] %v1493_v10  ;;  %v304_v10 = vld [vmem:[%s1131_s11 + $0x360] sm:$0xff]  ;;  %v305_v12 = vld [vmem:[%s1131_s11 + $0x368] sm:$0xff]  ;;  %v1553_v37 = vmul.f32 %v1153_v21, %v295_v53  ;;  %v1568_v52 = vmul.f32 %v1153_v21, %v299_v60 }
  0xe3   : > { %2154 = vst [vmem:[#allocation62_spill] sm:$0xff] %v1502_v22  ;;  %2155 = vst [vmem:[#allocation63_spill] sm:$0xff] %v1505_v20  ;;  %v306_v27 = vld [vmem:[%s1131_s11 + $0x370] sm:$0xff]  ;;  %v308_v20 = vld [vmem:[%s1131_s11 + $0x380] sm:$0xff]  ;;  %v1529_v22 = vmul.f32 %v1153_v21, %v288_v35  ;;  %v1547_v35 = vmul.f32 %v1153_v21, %v293_v51  ;;  %v1565_v51 = vmul.f32 %v1153_v21, %v298_v59 }
  0xe4   : > { %2156 = vst [vmem:[#allocation64_spill] sm:$0xff] %v1508_v19  ;;  %2157 = vst [vmem:[#allocation65_spill] sm:$0xff] %v1517_v34  ;;  %v307_v19 = vld [vmem:[%s1131_s11 + $0x378] sm:$0xff]  ;;  %v309_v43 = vld [vmem:[%s1131_s11 + $0x388] sm:$0xff]  ;;  %v1544_v34 = vmul.f32 %v1153_v21, %v292_v50  ;;  %v1562_v50 = vmul.f32 %v1153_v21, %v297_v58  ;;  %v1580_v58 = vmul.f32 %v1153_v21, %v302_v4 }
  0xe5   : > { %2158 = vst [vmem:[#allocation66_spill] sm:$0xff] %v1520_v29  ;;  %2159 = vst [vmem:[#allocation67_spill] sm:$0xff] %v1523_v28  ;;  %v310_v28 = vld [vmem:[%s1131_s11 + $0x390] sm:$0xff]  ;;  %v311_v29 = vld [vmem:[%s1131_s11 + $0x398] sm:$0xff]  ;;  %v1583_v59 = vmul.f32 %v1153_v21, %v303_v18  ;;  %v1604_v18 = vmul.f32 %v1153_v21, %v308_v20 }
  0xe6   : > { %2160 = vst [vmem:[#allocation68_spill] sm:$0xff] %v1532_v26  ;;  %2161 = vst [vmem:[#allocation69_spill] sm:$0xff] %v1535_v45  ;;  %v312_v42 = vld [vmem:[%s1131_s11 + $0x3a0] sm:$0xff]  ;;  %v314_v45 = vld [vmem:[%s1131_s11 + $0x3b0] sm:$0xff]  ;;  %v1559_v26 = vmul.f32 %v1153_v21, %v296_v2  ;;  %v1577_v2 = vmul.f32 %v1153_v21, %v301_v3  ;;  %v1598_v3 = vmul.f32 %v1153_v21, %v307_v19 }
  0xe7   : > { %2162 = vst [vmem:[#allocation70_spill] sm:$0xff] %v1538_v44  ;;  %2163 = vst [vmem:[#allocation71_spill] sm:$0xff] %v1547_v35  ;;  %v313_v44 = vld [vmem:[%s1131_s11 + $0x3a8] sm:$0xff]  ;;  %v315_v53 = vld [vmem:[%s1131_s11 + $0x3b8] sm:$0xff]  ;;  %v1574_v35 = vmul.f32 %v1153_v21, %v300_v11  ;;  %v1595_v11 = vmul.f32 %v1153_v21, %v306_v27  ;;  %v1615_v27 = vpop.permute.xlu0 %469  ;;  %v1618_v19 = vmul.f32 %v1153_v21, %v312_v42 }
  0xe8   : > { %2164 = vst [vmem:[#allocation72_spill] sm:$0xff] %v1550_v36  ;;  %2165 = vst [vmem:[#allocation73_spill] sm:$0xff] %v1553_v37  ;;  %v316_v37 = vld [vmem:[%s1131_s11 + $0x3c0] sm:$0xff]  ;;  %v317_v36 = vld [vmem:[%s1131_s11 + $0x3c8] sm:$0xff]  ;;  %v1624_v20 = vmul.f32 %v1153_v21, %v314_v45 }
  0xe9   : > { %2166 = vst [vmem:[#allocation74_spill] sm:$0xff] %v1559_v26  ;;  %2167 = vst [vmem:[#allocation75_spill] sm:$0xff] %v1562_v50  ;;  %v319_v60 = vld [vmem:[%s1131_s11 + $0x3d8] sm:$0xff]  ;;  %v1589_v50 = vmul.f32 %v1153_v21, %v304_v10  ;;  %v1592_v26 = vmul.f32 %v1153_v21, %v305_v12  ;;  %v321_v4 = vld [vmem:[%s1131_s11 + $0x3e8] sm:$0xff]  ;;  %v1610_v10 = vmul.f32 %v1153_v21, %v310_v28 }
  0xea   : > { %2168 = vst [vmem:[#allocation76_spill] sm:$0xff] %v1565_v51  ;;  %2169 = vst [vmem:[#allocation77_spill] sm:$0xff] %v1568_v52  ;;  %v318_v51 = vld [vmem:[%s1131_s11 + $0x3d0] sm:$0xff]  ;;  %v320_v52 = vld [vmem:[%s1131_s11 + $0x3e0] sm:$0xff]  ;;  %v1613_v12 = vmul.f32 %v1153_v21, %v311_v29  ;;  %v1630_v28 = vmul.f32 %v1153_v21, %v316_v37  ;;  %v1633_v29 = vmul.f32 %v1153_v21, %v317_v36 }
  0xeb   : > { %2170 = vst [vmem:[#allocation78_spill] sm:$0xff] %v1577_v2  ;;  %2171 = vst [vmem:[#allocation79_spill] sm:$0xff] %v1580_v58  ;;  %v322_v58 = vld [vmem:[%s1131_s11 + $0x3f0] sm:$0xff]  ;;  %v323_v2 = vld [vmem:[%s1131_s11 + $0x3f8] sm:$0xff]  ;;  %v1639_v42 = vmul.f32 %v1153_v21, %v319_v60  ;;  %v1645_v45 = vmul.f32 %v1153_v21, %v321_v4  ;;  %v472_v36 = vadd.f32 %v1615_v27, %v1164_v30 }
  0xec   : > { %2172 = vst [vmem:[#allocation80_spill] sm:$0xff] %v1583_v59  ;;  %2173 = vst [vmem:[#allocation81_spill] sm:$0xff] %v1598_v3  ;;  %v1607_v59 = vmul.f32 %v1153_v21, %v309_v43  ;;  %v1621_v3 = vmul.f32 %v1153_v21, %v313_v44  ;;  %v1627_v43 = vmul.f32 %v1153_v21, %v315_v53 }
  0xed   : > { %2174 = vst [vmem:[#allocation82_spill] sm:$0xff] %v1613_v12  ;;  %v1636_v12 = vmul.f32 %v1153_v21, %v318_v51  ;;  %v1642_v44 = vmul.f32 %v1153_v21, %v320_v52  ;;  %v1648_v53 = vmul.f32 %v1153_v21, %v322_v58  ;;  %v1651_v37 = vmul.f32 %v1153_v21, %v323_v2  ;;  %v2178_v2 = vld [vmem:[#allocation13_spill] sm:$0xff] }
  0xee   : > { %v473_v51 = vadd.f32 %v1615_v27, %v1167_v31  ;;  %v474_v52 = vadd.f32 %v1615_v27, %v1170_v32  ;;  %v475_v60 = vadd.f32 %v1615_v27, %v1173_v33  ;;  %v476_v4 = vadd.f32 %v1615_v27, %v1180_v38  ;;  %600 = vst [vmem:[%s1679_s25] sm:$0xff] %v472_v36  ;;  %v2179_v36 = vld [vmem:[#allocation14_spill] sm:$0xff] }
  0xef   : > { %v477_v58 = vadd.f32 %v1615_v27, %v1183_v39  ;;  %v478_v21 = vadd.f32 %v1615_v27, %v1186_v40  ;;  %v479_v30 = vadd.f32 %v1615_v27, %v1189_v41  ;;  %v480_v31 = vadd.f32 %v1615_v27, %v1196_v46 }
  0xf0   : > { %v481_v32 = vadd.f32 %v1615_v27, %v1199_v47  ;;  %v482_v33 = vadd.f32 %v1615_v27, %v1202_v48  ;;  %v483_v38 = vadd.f32 %v1615_v27, %v1205_v49  ;;  %601 = vst [vmem:[%s1679_s25 + $0x8] sm:$0xff] %v473_v51  ;;  %602 = vst [vmem:[%s1679_s25 + $0x10] sm:$0xff] %v474_v52  ;;  %v2180_v52 = vld [vmem:[#allocation15_spill] sm:$0xff] }
  0xf1   : > { %603 = vst [vmem:[%s1679_s25 + $0x18] sm:$0xff] %v475_v60  ;;  %v484_v39 = vadd.f32 %v1615_v27, %v1212_v54  ;;  %v485_v40 = vadd.f32 %v1615_v27, %v1215_v55  ;;  %v486_v41 = vadd.f32 %v1615_v27, %v1218_v56  ;;  %v487_v46 = vadd.f32 %v1615_v27, %v1221_v57 }
  0xf2   : > { %604 = vst [vmem:[%s1679_s25 + $0x20] sm:$0xff] %v476_v4  ;;  %605 = vst [vmem:[%s1679_s25 + $0x28] sm:$0xff] %v477_v58  ;;  %v488_v47 = vadd.f32 %v1615_v27, %v1228_v62  ;;  %v489_v48 = vadd.f32 %v1615_v27, %v1231_v63  ;;  %v490_v49 = vadd.f32 %v1615_v27, %v1234_v0  ;;  %v2181_v4 = vld [vmem:[#allocation16_spill] sm:$0xff] }
  0xf3   : > { %606 = vst [vmem:[%s1679_s25 + $0x30] sm:$0xff] %v478_v21  ;;  %607 = vst [vmem:[%s1679_s25 + $0x38] sm:$0xff] %v479_v30  ;;  %v491_v54 = vadd.f32 %v1615_v27, %v1237_v1  ;;  %v492_v55 = vadd.f32 %v1615_v27, %v1244_v6  ;;  %v493_v56 = vadd.f32 %v1615_v27, %v1247_v7  ;;  %v2182_v21 = vld [vmem:[#allocation17_spill] sm:$0xff] }
  0xf4   : > { %608 = vst [vmem:[%s1679_s25 + $0x40] sm:$0xff] %v480_v31  ;;  %609 = vst [vmem:[%s1679_s25 + $0x48] sm:$0xff] %v481_v32  ;;  %v494_v57 = vadd.f32 %v1615_v27, %v1250_v8  ;;  %v495_v62 = vadd.f32 %v1615_v27, %v1253_v9  ;;  %v496_v63 = vadd.f32 %v1615_v27, %v1260_v14  ;;  %v2175_v9 = vld [vmem:[#allocation10_spill] sm:$0xff] }
  0xf5   : > { %610 = vst [vmem:[%s1679_s25 + $0x50] sm:$0xff] %v482_v33  ;;  %611 = vst [vmem:[%s1679_s25 + $0x58] sm:$0xff] %v483_v38  ;;  %v497_v0 = vadd.f32 %v1615_v27, %v1263_v15  ;;  %v498_v1 = vadd.f32 %v1615_v27, %v1266_v16  ;;  %v499_v6 = vadd.f32 %v1615_v27, %v1269_v17  ;;  %v2176_v15 = vld [vmem:[#allocation11_spill] sm:$0xff]  ;;  %v2177_v17 = vld [vmem:[#allocation12_spill] sm:$0xff] }
  0xf6   : > { %612 = vst [vmem:[%s1679_s25 + $0x60] sm:$0xff] %v484_v39  ;;  %613 = vst [vmem:[%s1679_s25 + $0x68] sm:$0xff] %v485_v40  ;;  %v500_v7 = vadd.f32 %v1615_v27, %v1276_v23  ;;  %v501_v8 = vadd.f32 %v1615_v27, %v1279_v24  ;;  %v502_v14 = vadd.f32 %v1615_v27, %v2175_v9  ;;  %v2183_v31 = vld [vmem:[#allocation18_spill] sm:$0xff]  ;;  %v2184_v33 = vld [vmem:[#allocation19_spill] sm:$0xff] }
  0xf7   : > { %614 = vst [vmem:[%s1679_s25 + $0x70] sm:$0xff] %v486_v41  ;;  %615 = vst [vmem:[%s1679_s25 + $0x78] sm:$0xff] %v487_v46  ;;  %v503_v16 = vadd.f32 %v1615_v27, %v2176_v15  ;;  %v504_v23 = vadd.f32 %v1615_v27, %v2177_v17  ;;  %v505_v24 = vadd.f32 %v1615_v27, %v2178_v2  ;;  %v2185_v39 = vld [vmem:[#allocation20_spill] sm:$0xff]  ;;  %v2186_v41 = vld [vmem:[#allocation21_spill] sm:$0xff] }
  0xf8   : > { %616 = vst [vmem:[%s1679_s25 + $0x80] sm:$0xff] %v488_v47  ;;  %617 = vst [vmem:[%s1679_s25 + $0x88] sm:$0xff] %v489_v48  ;;  %v506_v51 = vadd.f32 %v1615_v27, %v2179_v36  ;;  %v507_v60 = vadd.f32 %v1615_v27, %v2180_v52  ;;  %v508_v58 = vadd.f32 %v1615_v27, %v2181_v4  ;;  %v2187_v47 = vld [vmem:[#allocation22_spill] sm:$0xff]  ;;  %v2194_v9 = vld [vmem:[#allocation29_spill] sm:$0xff] }
  0xf9   : > { %618 = vst [vmem:[%s1679_s25 + $0x90] sm:$0xff] %v490_v49  ;;  %619 = vst [vmem:[%s1679_s25 + $0x98] sm:$0xff] %v491_v54  ;;  %v509_v30 = vadd.f32 %v1615_v27, %v2182_v21  ;;  %v510_v32 = vadd.f32 %v1615_v27, %v2183_v31  ;;  %v511_v38 = vadd.f32 %v1615_v27, %v2184_v33  ;;  %v2188_v49 = vld [vmem:[#allocation23_spill] sm:$0xff]  ;;  %v2195_v15 = vld [vmem:[#allocation30_spill] sm:$0xff] }
  0xfa   : > { %620 = vst [vmem:[%s1679_s25 + $0xa0] sm:$0xff] %v492_v55  ;;  %621 = vst [vmem:[%s1679_s25 + $0xa8] sm:$0xff] %v493_v56  ;;  %v512_v40 = vadd.f32 %v1615_v27, %v2185_v39  ;;  %v513_v46 = vadd.f32 %v1615_v27, %v2186_v41  ;;  %v514_v48 = vadd.f32 %v1615_v27, %v2187_v47  ;;  %v2189_v55 = vld [vmem:[#allocation24_spill] sm:$0xff]  ;;  %v2196_v17 = vld [vmem:[#allocation31_spill] sm:$0xff] }
  0xfb   : > { %622 = vst [vmem:[%s1679_s25 + $0xb0] sm:$0xff] %v494_v57  ;;  %623 = vst [vmem:[%s1679_s25 + $0xb8] sm:$0xff] %v495_v62  ;;  %v515_v54 = vadd.f32 %v1615_v27, %v2188_v49  ;;  %v516_v56 = vadd.f32 %v1615_v27, %v2189_v55  ;;  %v2190_v57 = vld [vmem:[#allocation25_spill] sm:$0xff]  ;;  %v2197_v2 = vld [vmem:[#allocation32_spill] sm:$0xff] }
  0xfc   : > { %624 = vst [vmem:[%s1679_s25 + $0xc0] sm:$0xff] %v496_v63  ;;  %625 = vst [vmem:[%s1679_s25 + $0xc8] sm:$0xff] %v497_v0  ;;  %v517_v62 = vadd.f32 %v1615_v27, %v2190_v57  ;;  %v2191_v63 = vld [vmem:[#allocation26_spill] sm:$0xff]  ;;  %v2198_v36 = vld [vmem:[#allocation33_spill] sm:$0xff] }
  0xfd   : > { %626 = vst [vmem:[%s1679_s25 + $0xd0] sm:$0xff] %v498_v1  ;;  %627 = vst [vmem:[%s1679_s25 + $0xd8] sm:$0xff] %v499_v6  ;;  %v518_v0 = vadd.f32 %v1615_v27, %v2191_v63  ;;  %v2192_v1 = vld [vmem:[#allocation27_spill] sm:$0xff]  ;;  %v2199_v52 = vld [vmem:[#allocation34_spill] sm:$0xff] }
  0xfe   : > { %628 = vst [vmem:[%s1679_s25 + $0xe0] sm:$0xff] %v500_v7  ;;  %629 = vst [vmem:[%s1679_s25 + $0xe8] sm:$0xff] %v501_v8  ;;  %v519_v6 = vadd.f32 %v1615_v27, %v2192_v1  ;;  %v2193_v7 = vld [vmem:[#allocation28_spill] sm:$0xff]  ;;  %v2200_v4 = vld [vmem:[#allocation35_spill] sm:$0xff] }
  0xff   : > { %630 = vst [vmem:[%s1679_s25 + $0xf0] sm:$0xff] %v502_v14  ;;  %631 = vst [vmem:[%s1679_s25 + $0xf8] sm:$0xff] %v503_v16  ;;  %v520_v8 = vadd.f32 %v1615_v27, %v2193_v7  ;;  %v521_v14 = vadd.f32 %v1615_v27, %v2194_v9  ;;  %v522_v16 = vadd.f32 %v1615_v27, %v2195_v15  ;;  %v2201_v21 = vld [vmem:[#allocation36_spill] sm:$0xff]  ;;  %v2202_v31 = vld [vmem:[#allocation37_spill] sm:$0xff] }
 0x100   : > { %632 = vst [vmem:[%s1679_s25 + $0x100] sm:$0xff] %v504_v23  ;;  %633 = vst [vmem:[%s1679_s25 + $0x108] sm:$0xff] %v505_v24  ;;  %v523_v23 = vadd.f32 %v1615_v27, %v2196_v17  ;;  %v524_v24 = vadd.f32 %v1615_v27, %v2197_v2  ;;  %v2203_v33 = vld [vmem:[#allocation38_spill] sm:$0xff]  ;;  %v2204_v39 = vld [vmem:[#allocation39_spill] sm:$0xff] }
 0x101   : > { %634 = vst [vmem:[%s1679_s25 + $0x110] sm:$0xff] %v506_v51  ;;  %635 = vst [vmem:[%s1679_s25 + $0x118] sm:$0xff] %v507_v60  ;;  %v525_v51 = vadd.f32 %v1615_v27, %v2198_v36  ;;  %v526_v60 = vadd.f32 %v1615_v27, %v2199_v52  ;;  %v2205_v41 = vld [vmem:[#allocation40_spill] sm:$0xff]  ;;  %v2206_v47 = vld [vmem:[#allocation41_spill] sm:$0xff] }
 0x102   : > { %636 = vst [vmem:[%s1679_s25 + $0x120] sm:$0xff] %v508_v58  ;;  %637 = vst [vmem:[%s1679_s25 + $0x128] sm:$0xff] %v509_v30  ;;  %v527_v58 = vadd.f32 %v1615_v27, %v2200_v4  ;;  %v528_v30 = vadd.f32 %v1615_v27, %v2201_v21  ;;  %v2207_v49 = vld [vmem:[#allocation42_spill] sm:$0xff]  ;;  %v2208_v55 = vld [vmem:[#allocation43_spill] sm:$0xff] }
 0x103   : > { %638 = vst [vmem:[%s1679_s25 + $0x130] sm:$0xff] %v510_v32  ;;  %639 = vst [vmem:[%s1679_s25 + $0x138] sm:$0xff] %v511_v38  ;;  %v529_v32 = vadd.f32 %v1615_v27, %v2202_v31  ;;  %v530_v38 = vadd.f32 %v1615_v27, %v2203_v33  ;;  %v2209_v57 = vld [vmem:[#allocation44_spill] sm:$0xff]  ;;  %v2210_v63 = vld [vmem:[#allocation45_spill] sm:$0xff]  ;;  %v548_v31 = vadd.f32 %v1615_v27, %v1468_v25 }
 0x104   : > { %640 = vst [vmem:[%s1679_s25 + $0x140] sm:$0xff] %v512_v40  ;;  %641 = vst [vmem:[%s1679_s25 + $0x148] sm:$0xff] %v513_v46  ;;  %v531_v40 = vadd.f32 %v1615_v27, %v2204_v39  ;;  %v532_v46 = vadd.f32 %v1615_v27, %v2205_v41  ;;  %v2211_v1 = vld [vmem:[#allocation46_spill] sm:$0xff]  ;;  %v2212_v7 = vld [vmem:[#allocation47_spill] sm:$0xff]  ;;  %v552_v25 = vadd.f32 %v1615_v27, %v1484_v61 }
 0x105   : > { %642 = vst [vmem:[%s1679_s25 + $0x150] sm:$0xff] %v514_v48  ;;  %643 = vst [vmem:[%s1679_s25 + $0x158] sm:$0xff] %v515_v54  ;;  %v533_v48 = vadd.f32 %v1615_v27, %v2206_v47  ;;  %v534_v54 = vadd.f32 %v1615_v27, %v2207_v49  ;;  %v2213_v9 = vld [vmem:[#allocation48_spill] sm:$0xff]  ;;  %v2214_v15 = vld [vmem:[#allocation49_spill] sm:$0xff]  ;;  %v556_v61 = vadd.f32 %v1615_v27, %v1499_v5 }
 0x106   : > { %644 = vst [vmem:[%s1679_s25 + $0x160] sm:$0xff] %v516_v56  ;;  %645 = vst [vmem:[%s1679_s25 + $0x168] sm:$0xff] %v517_v62  ;;  %v535_v56 = vadd.f32 %v1615_v27, %v2208_v55  ;;  %v536_v62 = vadd.f32 %v1615_v27, %v2209_v57  ;;  %v2215_v17 = vld [vmem:[#allocation50_spill] sm:$0xff]  ;;  %v2216_v2 = vld [vmem:[#allocation51_spill] sm:$0xff]  ;;  %v560_v5 = vadd.f32 %v1615_v27, %v1514_v13 }
 0x107   : > { %646 = vst [vmem:[%s1679_s25 + $0x170] sm:$0xff] %v518_v0  ;;  %647 = vst [vmem:[%s1679_s25 + $0x178] sm:$0xff] %v519_v6  ;;  %v537_v0 = vadd.f32 %v1615_v27, %v2210_v63  ;;  %v538_v6 = vadd.f32 %v1615_v27, %v2211_v1  ;;  %v2217_v36 = vld [vmem:[#allocation52_spill] sm:$0xff]  ;;  %v2218_v52 = vld [vmem:[#allocation53_spill] sm:$0xff]  ;;  %v564_v13 = vadd.f32 %v1615_v27, %v1529_v22 }
 0x108   : > { %648 = vst [vmem:[%s1679_s25 + $0x180] sm:$0xff] %v520_v8  ;;  %649 = vst [vmem:[%s1679_s25 + $0x188] sm:$0xff] %v521_v14  ;;  %v539_v8 = vadd.f32 %v1615_v27, %v2212_v7  ;;  %v540_v14 = vadd.f32 %v1615_v27, %v2213_v9  ;;  %v2219_v4 = vld [vmem:[#allocation54_spill] sm:$0xff]  ;;  %v2220_v21 = vld [vmem:[#allocation55_spill] sm:$0xff]  ;;  %v568_v22 = vadd.f32 %v1615_v27, %v1544_v34 }
 0x109   : > { %650 = vst [vmem:[%s1679_s25 + $0x190] sm:$0xff] %v522_v16  ;;  %651 = vst [vmem:[%s1679_s25 + $0x198] sm:$0xff] %v523_v23  ;;  %v541_v16 = vadd.f32 %v1615_v27, %v2214_v15  ;;  %v542_v23 = vadd.f32 %v1615_v27, %v2215_v17 }
 0x10a   : > { %652 = vst [vmem:[%s1679_s25 + $0x1a0] sm:$0xff] %v524_v24  ;;  %653 = vst [vmem:[%s1679_s25 + $0x1a8] sm:$0xff] %v525_v51  ;;  %v543_v24 = vadd.f32 %v1615_v27, %v2216_v2  ;;  %v544_v51 = vadd.f32 %v1615_v27, %v2217_v36 }
 0x10b   : > { %654 = vst [vmem:[%s1679_s25 + $0x1b0] sm:$0xff] %v526_v60  ;;  %655 = vst [vmem:[%s1679_s25 + $0x1b8] sm:$0xff] %v527_v58  ;;  %v545_v60 = vadd.f32 %v1615_v27, %v2218_v52  ;;  %v546_v58 = vadd.f32 %v1615_v27, %v2219_v4 }
 0x10c   : > { %656 = vst [vmem:[%s1679_s25 + $0x1c0] sm:$0xff] %v528_v30  ;;  %657 = vst [vmem:[%s1679_s25 + $0x1c8] sm:$0xff] %v529_v32  ;;  %v547_v30 = vadd.f32 %v1615_v27, %v2220_v21  ;;  %v2221_v32 = vld [vmem:[#allocation56_spill] sm:$0xff] }
 0x10d   : > { %658 = vst [vmem:[%s1679_s25 + $0x1d0] sm:$0xff] %v530_v38  ;;  %659 = vst [vmem:[%s1679_s25 + $0x1d8] sm:$0xff] %v531_v40  ;;  %v549_v33 = vadd.f32 %v1615_v27, %v2221_v32  ;;  %v2222_v38 = vld [vmem:[#allocation57_spill] sm:$0xff]  ;;  %v2223_v40 = vld [vmem:[#allocation58_spill] sm:$0xff] }
 0x10e   : > { %660 = vst [vmem:[%s1679_s25 + $0x1e0] sm:$0xff] %v532_v46  ;;  %661 = vst [vmem:[%s1679_s25 + $0x1e8] sm:$0xff] %v533_v48  ;;  %v550_v39 = vadd.f32 %v1615_v27, %v2222_v38  ;;  %v551_v41 = vadd.f32 %v1615_v27, %v2223_v40  ;;  %v2224_v46 = vld [vmem:[#allocation59_spill] sm:$0xff]  ;;  %v2225_v48 = vld [vmem:[#allocation60_spill] sm:$0xff] }
 0x10f   : > { %662 = vst [vmem:[%s1679_s25 + $0x1f0] sm:$0xff] %v534_v54  ;;  %663 = vst [vmem:[%s1679_s25 + $0x1f8] sm:$0xff] %v535_v56  ;;  %v553_v47 = vadd.f32 %v1615_v27, %v2224_v46  ;;  %v554_v49 = vadd.f32 %v1615_v27, %v2225_v48  ;;  %v2226_v54 = vld [vmem:[#allocation61_spill] sm:$0xff]  ;;  %v2227_v56 = vld [vmem:[#allocation62_spill] sm:$0xff] }
 0x110   : > { %664 = vst [vmem:[%s1679_s25 + $0x200] sm:$0xff] %v536_v62  ;;  %665 = vst [vmem:[%s1679_s25 + $0x208] sm:$0xff] %v537_v0  ;;  %v555_v55 = vadd.f32 %v1615_v27, %v2226_v54  ;;  %v557_v57 = vadd.f32 %v1615_v27, %v2227_v56  ;;  %v2228_v62 = vld [vmem:[#allocation63_spill] sm:$0xff]  ;;  %v2229_v0 = vld [vmem:[#allocation64_spill] sm:$0xff] }
 0x111   : > { %666 = vst [vmem:[%s1679_s25 + $0x210] sm:$0xff] %v538_v6  ;;  %667 = vst [vmem:[%s1679_s25 + $0x218] sm:$0xff] %v539_v8  ;;  %v558_v63 = vadd.f32 %v1615_v27, %v2228_v62  ;;  %v559_v1 = vadd.f32 %v1615_v27, %v2229_v0  ;;  %v2230_v6 = vld [vmem:[#allocation65_spill] sm:$0xff]  ;;  %v2231_v8 = vld [vmem:[#allocation66_spill] sm:$0xff]  ;;  %v591_v0 = vadd.f32 %v1615_v27, %v1627_v43 }
 0x112   : > { %668 = vst [vmem:[%s1679_s25 + $0x220] sm:$0xff] %v540_v14  ;;  %669 = vst [vmem:[%s1679_s25 + $0x228] sm:$0xff] %v541_v16  ;;  %v561_v7 = vadd.f32 %v1615_v27, %v2230_v6  ;;  %v562_v9 = vadd.f32 %v1615_v27, %v2231_v8  ;;  %v2232_v14 = vld [vmem:[#allocation67_spill] sm:$0xff]  ;;  %v2233_v16 = vld [vmem:[#allocation68_spill] sm:$0xff]  ;;  %v597_v43 = vadd.f32 %v1615_v27, %v1645_v45 }
 0x113   : > { %670 = vst [vmem:[%s1679_s25 + $0x230] sm:$0xff] %v542_v23  ;;  %671 = vst [vmem:[%s1679_s25 + $0x238] sm:$0xff] %v543_v24  ;;  %v563_v15 = vadd.f32 %v1615_v27, %v2232_v14  ;;  %v565_v17 = vadd.f32 %v1615_v27, %v2233_v16  ;;  %v2234_v23 = vld [vmem:[#allocation69_spill] sm:$0xff]  ;;  %v2235_v24 = vld [vmem:[#allocation70_spill] sm:$0xff] }
 0x114   : > { %672 = vst [vmem:[%s1679_s25 + $0x240] sm:$0xff] %v544_v51  ;;  %673 = vst [vmem:[%s1679_s25 + $0x248] sm:$0xff] %v545_v60  ;;  %v566_v2 = vadd.f32 %v1615_v27, %v2234_v23  ;;  %v567_v36 = vadd.f32 %v1615_v27, %v2235_v24  ;;  %v2236_v51 = vld [vmem:[#allocation71_spill] sm:$0xff]  ;;  %v2237_v60 = vld [vmem:[#allocation72_spill] sm:$0xff] }
 0x115   : > { %674 = vst [vmem:[%s1679_s25 + $0x250] sm:$0xff] %v546_v58  ;;  %675 = vst [vmem:[%s1679_s25 + $0x258] sm:$0xff] %v547_v30  ;;  %v569_v52 = vadd.f32 %v1615_v27, %v2236_v51  ;;  %v570_v4 = vadd.f32 %v1615_v27, %v2237_v60  ;;  %v2238_v58 = vld [vmem:[#allocation73_spill] sm:$0xff]  ;;  %v2239_v30 = vld [vmem:[#allocation74_spill] sm:$0xff] }
 0x116   : > { %676 = vst [vmem:[%s1679_s25 + $0x260] sm:$0xff] %v548_v31  ;;  %677 = vst [vmem:[%s1679_s25 + $0x268] sm:$0xff] %v549_v33  ;;  %v571_v21 = vadd.f32 %v1615_v27, %v2238_v58  ;;  %v572_v34 = vadd.f32 %v1615_v27, %v2239_v30  ;;  %v2240_v31 = vld [vmem:[#allocation75_spill] sm:$0xff]  ;;  %v2241_v33 = vld [vmem:[#allocation76_spill] sm:$0xff] }
 0x117   : > { %678 = vst [vmem:[%s1679_s25 + $0x270] sm:$0xff] %v550_v39  ;;  %679 = vst [vmem:[%s1679_s25 + $0x278] sm:$0xff] %v551_v41  ;;  %v573_v32 = vadd.f32 %v1615_v27, %v2240_v31  ;;  %v574_v38 = vadd.f32 %v1615_v27, %v2241_v33  ;;  %v2242_v39 = vld [vmem:[#allocation77_spill] sm:$0xff]  ;;  %v576_v41 = vadd.f32 %v1615_v27, %v1574_v35  ;;  %v2247_v62 = vld [vmem:[#allocation82_spill] sm:$0xff] }
 0x118   : > { %680 = vst [vmem:[%s1679_s25 + $0x280] sm:$0xff] %v552_v25  ;;  %681 = vst [vmem:[%s1679_s25 + $0x288] sm:$0xff] %v553_v47  ;;  %v575_v40 = vadd.f32 %v1615_v27, %v2242_v39  ;;  %v2243_v25 = vld [vmem:[#allocation78_spill] sm:$0xff]  ;;  %v2244_v47 = vld [vmem:[#allocation79_spill] sm:$0xff]  ;;  %v580_v35 = vadd.f32 %v1615_v27, %v1589_v50  ;;  %v585_v50 = vadd.f32 %v1615_v27, %v1607_v59 }
 0x119   : > { %682 = vst [vmem:[%s1679_s25 + $0x290] sm:$0xff] %v554_v49  ;;  %683 = vst [vmem:[%s1679_s25 + $0x298] sm:$0xff] %v555_v55  ;;  %v577_v46 = vadd.f32 %v1615_v27, %v2243_v25  ;;  %v578_v48 = vadd.f32 %v1615_v27, %v2244_v47  ;;  %v2245_v49 = vld [vmem:[#allocation80_spill] sm:$0xff]  ;;  %v581_v55 = vadd.f32 %v1615_v27, %v1592_v26  ;;  %v2246_v56 = vld [vmem:[#allocation81_spill] sm:$0xff] }
 0x11a   : > { %684 = vst [vmem:[%s1679_s25 + $0x2a0] sm:$0xff] %v556_v61  ;;  %685 = vst [vmem:[%s1679_s25 + $0x2a8] sm:$0xff] %v557_v57  ;;  %v579_v54 = vadd.f32 %v1615_v27, %v2245_v49  ;;  %v582_v61 = vadd.f32 %v1615_v27, %v1595_v11  ;;  %v583_v57 = vadd.f32 %v1615_v27, %v2246_v56 }
 0x11b   : > { %686 = vst [vmem:[%s1679_s25 + $0x2b0] sm:$0xff] %v558_v63  ;;  %687 = vst [vmem:[%s1679_s25 + $0x2b8] sm:$0xff] %v559_v1  ;;  %v584_v26 = vadd.f32 %v1615_v27, %v1604_v18  ;;  %v586_v11 = vadd.f32 %v1615_v27, %v1610_v10  ;;  %v587_v63 = vadd.f32 %v1615_v27, %v2247_v62 }
 0x11c   : > { %688 = vst [vmem:[%s1679_s25 + $0x2c0] sm:$0xff] %v560_v5  ;;  %689 = vst [vmem:[%s1679_s25 + $0x2c8] sm:$0xff] %v561_v7  ;;  %v588_v18 = vadd.f32 %v1615_v27, %v1618_v19  ;;  %v589_v59 = vadd.f32 %v1615_v27, %v1621_v3  ;;  %v590_v10 = vadd.f32 %v1615_v27, %v1624_v20 }
 0x11d   : > { %690 = vst [vmem:[%s1679_s25 + $0x2d0] sm:$0xff] %v562_v9  ;;  %691 = vst [vmem:[%s1679_s25 + $0x2d8] sm:$0xff] %v563_v15  ;;  %v592_v1 = vadd.f32 %v1615_v27, %v1630_v28  ;;  %v593_v19 = vadd.f32 %v1615_v27, %v1633_v29  ;;  %v594_v3 = vadd.f32 %v1615_v27, %v1636_v12 }
 0x11e   : > { %692 = vst [vmem:[%s1679_s25 + $0x2e0] sm:$0xff] %v564_v13  ;;  %693 = vst [vmem:[%s1679_s25 + $0x2e8] sm:$0xff] %v565_v17  ;;  %v595_v20 = vadd.f32 %v1615_v27, %v1639_v42  ;;  %v596_v12 = vadd.f32 %v1615_v27, %v1642_v44  ;;  %v598_v28 = vadd.f32 %v1615_v27, %v1648_v53 }
 0x11f   : > { %694 = vst [vmem:[%s1679_s25 + $0x2f0] sm:$0xff] %v566_v2  ;;  %695 = vst [vmem:[%s1679_s25 + $0x2f8] sm:$0xff] %v567_v36  ;;  %v599_v29 = vadd.f32 %v1615_v27, %v1651_v37 }
 0x120   : > { %696 = vst [vmem:[%s1679_s25 + $0x300] sm:$0xff] %v568_v22  ;;  %697 = vst [vmem:[%s1679_s25 + $0x308] sm:$0xff] %v569_v52 }
 0x121   : > { %698 = vst [vmem:[%s1679_s25 + $0x310] sm:$0xff] %v570_v4  ;;  %699 = vst [vmem:[%s1679_s25 + $0x318] sm:$0xff] %v571_v21 }
 0x122   : > { %700 = vst [vmem:[%s1679_s25 + $0x320] sm:$0xff] %v572_v34  ;;  %701 = vst [vmem:[%s1679_s25 + $0x328] sm:$0xff] %v573_v32 }
 0x123   : > { %702 = vst [vmem:[%s1679_s25 + $0x330] sm:$0xff] %v574_v38  ;;  %703 = vst [vmem:[%s1679_s25 + $0x338] sm:$0xff] %v575_v40 }
 0x124   : > { %704 = vst [vmem:[%s1679_s25 + $0x340] sm:$0xff] %v576_v41  ;;  %705 = vst [vmem:[%s1679_s25 + $0x348] sm:$0xff] %v577_v46 }
 0x125   : > { %706 = vst [vmem:[%s1679_s25 + $0x350] sm:$0xff] %v578_v48  ;;  %707 = vst [vmem:[%s1679_s25 + $0x358] sm:$0xff] %v579_v54 }
 0x126   : > { %708 = vst [vmem:[%s1679_s25 + $0x360] sm:$0xff] %v580_v35  ;;  %709 = vst [vmem:[%s1679_s25 + $0x368] sm:$0xff] %v581_v55 }
 0x127   : > { %710 = vst [vmem:[%s1679_s25 + $0x370] sm:$0xff] %v582_v61  ;;  %711 = vst [vmem:[%s1679_s25 + $0x378] sm:$0xff] %v583_v57 }
 0x128   : > { %712 = vst [vmem:[%s1679_s25 + $0x380] sm:$0xff] %v584_v26  ;;  %713 = vst [vmem:[%s1679_s25 + $0x388] sm:$0xff] %v585_v50 }
 0x129   : > { %714 = vst [vmem:[%s1679_s25 + $0x390] sm:$0xff] %v586_v11  ;;  %715 = vst [vmem:[%s1679_s25 + $0x398] sm:$0xff] %v587_v63 }
 0x12a   : > { %716 = vst [vmem:[%s1679_s25 + $0x3a0] sm:$0xff] %v588_v18  ;;  %717 = vst [vmem:[%s1679_s25 + $0x3a8] sm:$0xff] %v589_v59 }
 0x12b   : > { %718 = vst [vmem:[%s1679_s25 + $0x3b0] sm:$0xff] %v590_v10  ;;  %719 = vst [vmem:[%s1679_s25 + $0x3b8] sm:$0xff] %v591_v0 }
 0x12c   : > { %720 = vst [vmem:[%s1679_s25 + $0x3c0] sm:$0xff] %v592_v1  ;;  %721 = vst [vmem:[%s1679_s25 + $0x3c8] sm:$0xff] %v593_v19 }
 0x12d   : > { %722 = vst [vmem:[%s1679_s25 + $0x3d0] sm:$0xff] %v594_v3  ;;  %723 = vst [vmem:[%s1679_s25 + $0x3d8] sm:$0xff] %v595_v20 }
 0x12e   : > { %724 = vst [vmem:[%s1679_s25 + $0x3e0] sm:$0xff] %v596_v12  ;;  %725 = vst [vmem:[%s1679_s25 + $0x3e8] sm:$0xff] %v597_v43 }
 0x12f   : > { %726 = vst [vmem:[%s1679_s25 + $0x3f0] sm:$0xff] %v598_v28  ;;  %727 = vst [vmem:[%s1679_s25 + $0x3f8] sm:$0xff] %v599_v29 }
 0x130   : > { %933 = shalt.err (!%p930_p2)
}
 0x131   : > { %s934_s21 = scalar_lea.hbm %s2026_s10, 16384  ;;  %s938_s28 = scalar_lea.hbm %s2094_s3, 32768 }
 0x132   : > { %p935_p4 = scmp.ne.s32.totalorder %s2026_s10, %s934_s21  ;;  %p939_p9 = scmp.lt.u32.totalorder %s2026_s10, %s2094_s3 }
 0x133   : > { %p940_p1 = scmp.lt.u32.totalorder %s938_s28, %s934_s21  ;;  %p942_p6 = scmp.lt.u32.totalorder %s934_s21, %s2026_s10 }
 0x134   : > { %p936_p5 = pnand %p935_p4, %p2248_p11 }
 0x135   : > { %p941_p3 = por %p940_p1, %p939_p9 }
 0x136   : > { %p937_p7 = pneg %p936_p5 }
 0x137   : > { %p943_p12 = por %p942_p6, %p941_p3 }
 0x139   : > { %p944_p13 = pnand %p943_p12, %p937_p7 }
 0x13b   : > { %947 = shalt.err (!%p944_p13)
}
 0x13c   : > { %s993_s5 = smov 512   ;;  %s994_s7 = smov 32  }
 0x13d   : > { %840 = dma.vmem_to_hbm [thread:$0]  (%p2248_p11), %s2028_s8, 16384, %s2026_s10, %s729_s12, %s993_s5, %s993_s5, %s994_s7  }
 0x13e PF: > { %s758_s11 = sand.u32 1, %s974_s16   ;;  %p2249_p8 = scmp.ne.s32.totalorder %s2100_s27, 0 }
 0x13f   : > { %p2250_p10 = scmp.ge.s32.totalorder %s986_s19, 2  ;;  %s759_s25 = scalar_lea.sflag [#allocation6], %s758_s11 }
 0x141   : > { %p847_p0 = pnand %p2250_p10, %p2249_p8 }
 0x143   : > { %969 = dma.done.wait (!%p847_p0), %s759_s25, 16384  }
 0x144   : > { %971 = vsyncadd (!%p847_p0), %s759_s25, 4294950912  ;;  %p20_p2 = scmp.ge.s32.totalorder %s1046_s20, 4   ;;  %s2251_s16 = smov %s978_s17 }
 0x145   : > { %s2252_s17 = smov %s982_s18  ;;  %s2253_s18 = smov %s1058_s23 }
 0x146   : > { %s2254_s19 = smov %s1046_s20  ;;  %22 = sbr.rel (!%p20_p2) target bundleno = 8 (0x8), region = 77 }
 0x14d   :  { %764 = vsyncpa [#allocation5], 1 }
 0x14e   :  { %766 = vsyncpa [#allocation5 + $0x1], 1 }
 0x14f   :  { %767 = vsyncpa [#allocation6], 1 }
 0x150   :  { %769 = vsyncpa [#allocation6 + $0x1], 1 }

</bundles_post_ra>
